<compile_context>
chip_gen: v7x
topology: tpu7x:2x2x1
jax: 0.10.0
libtpu: 0.0.40
codegen_flags: <defaults>
</compile_context>

<pallas_src>
import math

import jax
import jax.numpy as jnp
from jax.experimental import pallas as pl
from jax.experimental.pallas import tpu as pltpu


def _round_up(x, m):
    return ((x + m - 1) // m) * m


# ----------------------------------------------------------------------------
# Exact (erf-based) GELU, matching PyTorch nn.GELU() default.
# Abramowitz & Stegun 7.1.26 rational approximation (|err| < ~2e-7); built
# from exp / mul / add / where only, so it always lowers in Mosaic.  Only used
# in the one-shot head kernel, so its cost is irrelevant.
# (jax.lax.erf would also lower and is slightly more accurate.)
# ----------------------------------------------------------------------------
_SQRT_HALF = 0.7071067811865476


def _erf_f32(x):
    a1, a2, a3, a4, a5 = (0.254829592, -0.284496736, 1.421413741,
                          -1.453152027, 1.061405429)
    p = 0.3275911
    sign = jnp.where(x >= 0.0, 1.0, -1.0)
    ax = jnp.abs(x)
    t = 1.0 / (1.0 + p * ax)
    poly = ((((a5 * t + a4) * t + a3) * t + a2) * t + a1) * t
    return sign * (1.0 - poly * jnp.exp(-ax * ax))


def _gelu_exact(x):
    return x * 0.5 * (1.0 + _erf_f32(x * _SQRT_HALF))


# ----------------------------------------------------------------------------
# Kernel A: one-shot MLP head (Linear1 -> GELU -> Linear2 -> GELU), all f32.
# ----------------------------------------------------------------------------
def _head_kernel(x_ref, w1_ref, b1_ref, w2_ref, b2_ref, h2_ref):
    h = jnp.dot(x_ref[...], w1_ref[...], preferred_element_type=jnp.float32)
    h = _gelu_exact(h + b1_ref[...])
    h = jnp.dot(h, w2_ref[...], preferred_element_type=jnp.float32)
    h = _gelu_exact(h + b2_ref[...])
    h2_ref[...] = h.astype(h2_ref.dtype)


# ----------------------------------------------------------------------------
# Kernel B: one output-feature tile of the projection (h2 @ w3_tile + b3_tile).
# ----------------------------------------------------------------------------
def _proj_kernel(h2_ref, w3_ref, b3_ref, o_ref):
    acc = jnp.dot(h2_ref[...], w3_ref[...],
                  preferred_element_type=jnp.float32)        # (B_pad, tn) f32
    o_ref[...] = (acc + b3_ref[...]).astype(o_ref.dtype)


# ----------------------------------------------------------------------------
# Generation-aware VMEM budget (conservative so it is safe on every chip).
# ----------------------------------------------------------------------------
def _select_vmem_limit_bytes():
    kind = ""
    try:
        kind = jax.devices()[0].device_kind.lower()
    except Exception:
        pass
    if "v5" in kind or "v6" in kind:
        return 80 * 1024 * 1024        # 128 MiB physical VMEM on v5e / v6e
    return 44 * 1024 * 1024            # v7x has 64 MiB/TC; safe fallback elsewhere


# ----------------------------------------------------------------------------
# One-time parameter preparation (NOT in the per-step hot path).
# ----------------------------------------------------------------------------
def prepare_weight_generator_params(params, *, tile_n=None,
                                    weight_dtype=jnp.bfloat16,
                                    out_dtype=jnp.float32,
                                    max_batch=8):
    """Convert PyTorch-style (out,in) params to kernel layout once.

    - weights transposed to (in, out): lane axis = output features
    - w3/b3 zero-padded to a lane-dense multiple of the output tile width
    - w3 down-cast (bf16 default: its HBM stream is the binding cost);
      w1/w2/biases stay f32 (tiny, used only in the one-shot head kernel)
    - tile width tn derived from a generation-aware VMEM budget unless given.
    """
    w1 = jnp.asarray(params["w1"], jnp.float32).T               # (D_in, H)
    w2 = jnp.asarray(params["w2"], jnp.float32).T               # (H, H)
    w3 = jnp.asarray(params["w3"]).T.astype(weight_dtype)       # (H, T)
    b1 = jnp.asarray(params["b1"], jnp.float32)[None, :]        # (1, H)
    b2 = jnp.asarray(params["b2"], jnp.float32)[None, :]        # (1, H)
    b3 = jnp.asarray(params["b3"], jnp.float32)[None, :]        # (1, T)

    hidden, target_dim = w3.shape
    b_pad = _round_up(max(max_batch, 8), 8)
    vmem_limit = _select_vmem_limit_bytes()

    w_bytes = jnp.dtype(weight_dtype).itemsize
    o_bytes = jnp.dtype(out_dtype).itemsize
    t_full = _round_up(target_dim, 128)

    if tile_n is None:
        # Double-buffered streamed bytes per output column: w3, b3, out tiles.
        per_col = 2 * (hidden * w_bytes + 4 + b_pad * o_bytes)
        resident = b_pad * hidden * w_bytes                      # h2 in VMEM
        avail = max(int(vmem_limit * 0.7) - resident, 128 * per_col)
        tn = (avail // per_col) // 128 * 128
        tn = max(128, min(8192, tn))
    else:
        tn = max(128, _round_up(tile_n, 128))

    tn = min(tn, t_full)
    # Keep >= 2 tiles when possible so the "parallel" axis feeds both v7x TCs.
    if tn >= t_full and t_full >= 256:
        tn = _round_up(t_full // 2, 128)
    t_pad = _round_up(target_dim, tn)

    w3 = jnp.pad(w3, ((0, 0), (0, t_pad - target_dim)))
    b3 = jnp.pad(b3, ((0, 0), (0, t_pad - target_dim)))

    return {"w1": w1, "b1": b1, "w2": w2, "b2": b2, "w3": w3, "b3": b3,
            "target_dim": target_dim, "hidden": hidden, "tile_n": tn,
            "weight_dtype": weight_dtype, "out_dtype": out_dtype,
            "vmem_limit": vmem_limit}


# ----------------------------------------------------------------------------
# Forward wrapper: head pallas_call (once) + tiled projection pallas_call.
# ----------------------------------------------------------------------------
def weight_generator_forward(sinusoidal_emb, prepared, *, return_padded=False):
    """sinusoidal_emb: (batch, 2*time_dim+1); prepared: see above."""
    x = jnp.asarray(sinusoidal_emb, jnp.float32)
    batch, d_in = x.shape

    w1, b1 = prepared["w1"], prepared["b1"]
    w2, b2 = prepared["w2"], prepared["b2"]
    w3, b3 = prepared["w3"], prepared["b3"]
    hidden = prepared["hidden"]
    target_dim = prepared["target_dim"]
    tn = prepared["tile_n"]
    w_dtype = prepared["weight_dtype"]
    out_dtype = prepared["out_dtype"]
    vmem_limit = prepared["vmem_limit"]

    t_pad = w3.shape[1]
    n_tiles = t_pad // tn

    # Sublane-align the (tiny) batch; padded rows are sliced off afterwards.
    b_pad = _round_up(max(batch, 8), 8)
    if b_pad != batch:
        x = jnp.pad(x, ((0, b_pad - batch), (0, 0)))

    def full_spec(shape):
        return pl.BlockSpec(shape, lambda i, _s=shape: (0,) * len(_s))

    # ---- Kernel A: h2 = gelu(gelu(x@w1+b1)@w2+b2), computed exactly once ----
    head_cost = pl.CostEstimate(
        flops=int(2 * b_pad * (d_in * hidden + hidden * hidden)),
        transcendentals=int(2 * b_pad * hidden),
        bytes_accessed=int(sum(a.size * a.dtype.itemsize
                               for a in (x, w1, b1, w2, b2))
                           + b_pad * hidden * jnp.dtype(w_dtype).itemsize))
    h2 = pl.pallas_call(
        _head_kernel,
        out_shape=jax.ShapeDtypeStruct((b_pad, hidden), w_dtype),
        grid=(1,),
        in_specs=[full_spec(x.shape), full_spec(w1.shape), full_spec(b1.shape),
                  full_spec(w2.shape), full_spec(b2.shape)],
        out_specs=full_spec((b_pad, hidden)),
        cost_estimate=head_cost,
    )(x, w1, b1, w2, b2)

    # ---- Kernel B: stream w3 over output-feature tiles --------------------
    proj_cost = pl.CostEstimate(
        flops=int(2 * b_pad * hidden * t_pad),
        transcendentals=0,
        bytes_accessed=int(h2.size * h2.dtype.itemsize
                           + w3.size * w3.dtype.itemsize
                           + b3.size * b3.dtype.itemsize
                           + b_pad * t_pad * jnp.dtype(out_dtype).itemsize))
    out = pl.pallas_call(
        _proj_kernel,
        out_shape=jax.ShapeDtypeStruct((b_pad, t_pad), out_dtype),
        grid=(n_tiles,),
        in_specs=[
            pl.BlockSpec((b_pad, hidden), lambda j: (0, 0)),   # h2: VMEM-resident
            pl.BlockSpec((hidden, tn), lambda j: (0, j)),      # w3 tile: streamed
            pl.BlockSpec((1, tn), lambda j: (0, j)),           # b3 tile: streamed
        ],
        out_specs=pl.BlockSpec((b_pad, tn), lambda j: (0, j)),
        compiler_params=pltpu.CompilerParams(
            dimension_semantics=("parallel",),   # shards tiles across v7x TCs
            vmem_limit_bytes=vmem_limit,
        ),
        cost_estimate=proj_cost,
    )(h2, w3, b3)

    if return_padded:
        return out                     # (b_pad, t_pad): avoids the slice copy
    return out[:batch, :target_dim]


# ----------------------------------------------------------------------------
# Parameter construction (deterministic, PyTorch nn.Linear-style init)
# ----------------------------------------------------------------------------
def _linear_init(key, out_features, in_features):
    kw, kb = jax.random.split(key)
    bound = 1.0 / math.sqrt(in_features)
    w = jax.random.uniform(kw, (out_features, in_features), jnp.float32,
                           -bound, bound)
    b = jax.random.uniform(kb, (out_features,), jnp.float32, -bound, bound)
    return w, b


def make_weight_generator_params(key, time_dim, hidden_dim,
                                 target_in_features, target_out_features,
                                 rank, target_has_bias=True):
    """Mirror WeightGenerator.__init__ for a target nn.Linear module."""
    input_dim = 2 * time_dim + 1
    target_dim = (rank * (target_in_features + target_out_features)
                  + int(target_has_bias) * target_out_features)

    k1, k2, k3 = jax.random.split(key, 3)
    w1, b1 = _linear_init(k1, hidden_dim, input_dim)
    w2, b2 = _linear_init(k2, hidden_dim, hidden_dim)
    w3, b3 = _linear_init(k3, target_dim, hidden_dim)
    return ({"w1": w1, "b1": b1, "w2": w2, "b2": b2, "w3": w3, "b3": b3},
            input_dim, target_dim)


# ----------------------------------------------------------------------------
# Pure-JAX reference (exact GELU, PyTorch-style weights)
# ----------------------------------------------------------------------------
def _reference_forward(x, p):
    dot = lambda a, b: jnp.dot(a, b, precision=jax.lax.Precision.HIGHEST)
    h = jax.nn.gelu(dot(x, p["w1"].T) + p["b1"], approximate=False)
    h = jax.nn.gelu(dot(h, p["w2"].T) + p["b2"], approximate=False)
    return dot(h, p["w3"].T) + p["b3"]


if __name__ == "__main__":
    key = jax.random.PRNGKey(0)
    k_params, k_emb, k_params2, k_emb2 = jax.random.split(key, 4)

    # --- Config A: small, module-consistent (target nn.Linear(16,16,bias)) ---
    time_dim = 8            # -> input_dim = 17
    hidden_dim = 32
    rank = 2
    batch = 4               # -> target_dim = 2*(16+16)+16 = 80
    params, input_dim, target_dim = make_weight_generator_params(
        k_params, time_dim, hidden_dim, 16, 16, rank, target_has_bias=True)
    emb = jax.random.normal(k_emb, (batch, input_dim), jnp.float32)
    ref = _reference_forward(emb, params)

    # f32 projection weights: near-exact path.
    prep_f32 = prepare_weight_generator_params(params, weight_dtype=jnp.float32)
    out_f32 = jax.block_until_ready(weight_generator_forward(emb, prep_f32))
    assert out_f32.shape == (batch, target_dim)
    assert jnp.allclose(out_f32, ref, atol=1e-4, rtol=1e-4)

    # bf16 projection weights (default): HBM-bandwidth-optimized path.
    prep_bf16 = prepare_weight_generator_params(params)   # bf16 w3, auto tn
    out_bf16 = jax.block_until_ready(weight_generator_forward(emb, prep_bf16))
    assert out_bf16.shape == (batch, target_dim)
    assert jnp.allclose(out_bf16, ref, atol=5e-2, rtol=5e-2)

    # --- Config B: multi-tile projection (target nn.Linear(128,128,bias)) ---
    # target_dim = 4*(128+128)+128 = 1152 -> tn chosen so n_tiles >= 2.
    params2, input_dim2, target_dim2 = make_weight_generator_params(
        k_params2, time_dim, 64, 128, 128, 4, target_has_bias=True)
    emb2 = jax.random.normal(k_emb2, (batch, input_dim2), jnp.float32)
    ref2 = _reference_forward(emb2, params2)

    prep2 = prepare_weight_generator_params(params2)       # bf16, auto tn
    assert prep2["w3"].shape[1] // prep2["tile_n"] >= 2     # megacore-friendly grid
    out2 = jax.block_until_ready(weight_generator_forward(emb2, prep2))
    assert out2.shape == (batch, target_dim2)
    assert jnp.allclose(out2, ref2, atol=5e-2, rtol=5e-2)

    print("KERNEL_OK")
</pallas_src>

<mosaic_0001>
module attributes {stable_mosaic.version = 11 : i64} {
  func.func @_head_kernel(%arg0: i32, %arg1: memref<8x17xf32, #tpu.memory_space<vmem>>, %arg2: memref<17x32xf32, #tpu.memory_space<vmem>>, %arg3: memref<1x32xf32, #tpu.memory_space<vmem>>, %arg4: memref<32x32xf32, #tpu.memory_space<vmem>>, %arg5: memref<1x32xf32, #tpu.memory_space<vmem>>, %arg6: memref<8x32xf32, #tpu.memory_space<vmem>>) attributes {dimension_semantics = [#tpu.dimension_semantics<arbitrary>], iteration_bounds = array<i64: 1>, scalar_prefetch = 0 : i64, scratch_operands = 0 : i64, tpu.core_type = #tpu.core_type<tc>, window_params = [{pipeline_mode = #tpu.pipeline_mode<synchronous>, transform_indices = @transform_0, window_bounds = array<i64: 8, 17>}, {pipeline_mode = #tpu.pipeline_mode<synchronous>, transform_indices = @transform_1, window_bounds = array<i64: 17, 32>}, {pipeline_mode = #tpu.pipeline_mode<synchronous>, transform_indices = @transform_2, window_bounds = array<i64: 1, 32>}, {pipeline_mode = #tpu.pipeline_mode<synchronous>, transform_indices = @transform_3, window_bounds = array<i64: 32, 32>}, {pipeline_mode = #tpu.pipeline_mode<synchronous>, transform_indices = @transform_4, window_bounds = array<i64: 1, 32>}, {pipeline_mode = #tpu.pipeline_mode<synchronous>, transform_indices = @transform_5, window_bounds = array<i64: 8, 32>}]} {
    %c0 = arith.constant 0 : index
    %c0_0 = arith.constant 0 : index
    %0 = vector.load %arg1[%c0, %c0_0] : memref<8x17xf32, #tpu.memory_space<vmem>>, vector<8x17xf32>
    %c0_1 = arith.constant 0 : index
    %c0_2 = arith.constant 0 : index
    %1 = vector.load %arg2[%c0_1, %c0_2] : memref<17x32xf32, #tpu.memory_space<vmem>>, vector<17x32xf32>
    %cst = arith.constant dense<0.000000e+00> : vector<8x32xf32>
    %2 = tpu.matmul %0, %1, %cst {dimension_numbers = #tpu.dot_dimension_numbers<[1], [0], [0], [1], [0, 0, 1, 1], [], []>} : vector<8x17xf32>, vector<17x32xf32>, vector<8x32xf32> -> vector<8x32xf32>
    %c0_3 = arith.constant 0 : index
    %c0_4 = arith.constant 0 : index
    %3 = vector.load %arg3[%c0_3, %c0_4] : memref<1x32xf32, #tpu.memory_space<vmem>>, vector<1x32xf32>
    %4 = vector.broadcast %3 : vector<1x32xf32> to vector<8x32xf32>
    %5 = arith.addf %2, %4 : vector<8x32xf32>
    %cst_5 = arith.constant 5.000000e-01 : f32
    %6 = vector.broadcast %cst_5 : f32 to vector<8x32xf32>
    %7 = arith.mulf %5, %6 : vector<8x32xf32>
    %cst_6 = arith.constant 0.707106769 : f32
    %8 = vector.broadcast %cst_6 : f32 to vector<8x32xf32>
    %9 = arith.mulf %5, %8 : vector<8x32xf32>
    %cst_7 = arith.constant 0.000000e+00 : f32
    %10 = vector.broadcast %cst_7 : f32 to vector<8x32xf32>
    %11 = arith.cmpf oge, %9, %10 : vector<8x32xf32>
    %cst_8 = arith.constant 1.000000e+00 : f32
    %cst_9 = arith.constant -1.000000e+00 : f32
    %12 = vector.broadcast %cst_8 : f32 to vector<8x32xf32>
    %13 = vector.broadcast %cst_9 : f32 to vector<8x32xf32>
    %14 = arith.select %11, %12, %13 : vector<8x32xi1>, vector<8x32xf32>
    %15 = math.absf %9 : vector<8x32xf32>
    %cst_10 = arith.constant 0.327591091 : f32
    %16 = vector.broadcast %cst_10 : f32 to vector<8x32xf32>
    %17 = arith.mulf %16, %15 : vector<8x32xf32>
    %cst_11 = arith.constant 1.000000e+00 : f32
    %18 = vector.broadcast %cst_11 : f32 to vector<8x32xf32>
    %19 = arith.addf %18, %17 : vector<8x32xf32>
    %cst_12 = arith.constant 1.000000e+00 : f32
    %20 = vector.broadcast %cst_12 : f32 to vector<8x32xf32>
    %21 = arith.divf %20, %19 : vector<8x32xf32>
    %cst_13 = arith.constant 1.06140542 : f32
    %22 = vector.broadcast %cst_13 : f32 to vector<8x32xf32>
    %23 = arith.mulf %22, %21 : vector<8x32xf32>
    %cst_14 = arith.constant -1.45315206 : f32
    %24 = vector.broadcast %cst_14 : f32 to vector<8x32xf32>
    %25 = arith.addf %23, %24 : vector<8x32xf32>
    %26 = arith.mulf %25, %21 : vector<8x32xf32>
    %cst_15 = arith.constant 1.42141378 : f32
    %27 = vector.broadcast %cst_15 : f32 to vector<8x32xf32>
    %28 = arith.addf %26, %27 : vector<8x32xf32>
    %29 = arith.mulf %28, %21 : vector<8x32xf32>
    %cst_16 = arith.constant -0.284496725 : f32
    %30 = vector.broadcast %cst_16 : f32 to vector<8x32xf32>
    %31 = arith.addf %29, %30 : vector<8x32xf32>
    %32 = arith.mulf %31, %21 : vector<8x32xf32>
    %cst_17 = arith.constant 0.254829586 : f32
    %33 = vector.broadcast %cst_17 : f32 to vector<8x32xf32>
    %34 = arith.addf %32, %33 : vector<8x32xf32>
    %35 = arith.mulf %34, %21 : vector<8x32xf32>
    %cst_18 = arith.constant 0.000000e+00 : f32
    %36 = vector.broadcast %cst_18 : f32 to vector<8x32xf32>
    %37 = arith.subf %36, %15 : vector<8x32xf32>
    %38 = arith.mulf %37, %15 : vector<8x32xf32>
    %39 = math.exp %38 : vector<8x32xf32>
    %40 = arith.mulf %35, %39 : vector<8x32xf32>
    %cst_19 = arith.constant 1.000000e+00 : f32
    %41 = vector.broadcast %cst_19 : f32 to vector<8x32xf32>
    %42 = arith.subf %41, %40 : vector<8x32xf32>
    %43 = arith.mulf %14, %42 : vector<8x32xf32>
    %cst_20 = arith.constant 1.000000e+00 : f32
    %44 = vector.broadcast %cst_20 : f32 to vector<8x32xf32>
    %45 = arith.addf %44, %43 : vector<8x32xf32>
    %46 = arith.mulf %7, %45 : vector<8x32xf32>
    %c0_21 = arith.constant 0 : index
    %c0_22 = arith.constant 0 : index
    %47 = vector.load %arg4[%c0_21, %c0_22] : memref<32x32xf32, #tpu.memory_space<vmem>>, vector<32x32xf32>
    %cst_23 = arith.constant dense<0.000000e+00> : vector<8x32xf32>
    %48 = tpu.matmul %46, %47, %cst_23 {dimension_numbers = #tpu.dot_dimension_numbers<[1], [0], [0], [1], [0, 0, 1, 1], [], []>} : vector<8x32xf32>, vector<32x32xf32>, vector<8x32xf32> -> vector<8x32xf32>
    %c0_24 = arith.constant 0 : index
    %c0_25 = arith.constant 0 : index
    %49 = vector.load %arg5[%c0_24, %c0_25] : memref<1x32xf32, #tpu.memory_space<vmem>>, vector<1x32xf32>
    %50 = vector.broadcast %49 : vector<1x32xf32> to vector<8x32xf32>
    %51 = arith.addf %48, %50 : vector<8x32xf32>
    %cst_26 = arith.constant 5.000000e-01 : f32
    %52 = vector.broadcast %cst_26 : f32 to vector<8x32xf32>
    %53 = arith.mulf %51, %52 : vector<8x32xf32>
    %cst_27 = arith.constant 0.707106769 : f32
    %54 = vector.broadcast %cst_27 : f32 to vector<8x32xf32>
    %55 = arith.mulf %51, %54 : vector<8x32xf32>
    %cst_28 = arith.constant 0.000000e+00 : f32
    %56 = vector.broadcast %cst_28 : f32 to vector<8x32xf32>
    %57 = arith.cmpf oge, %55, %56 : vector<8x32xf32>
    %cst_29 = arith.constant 1.000000e+00 : f32
    %cst_30 = arith.constant -1.000000e+00 : f32
    %58 = vector.broadcast %cst_29 : f32 to vector<8x32xf32>
    %59 = vector.broadcast %cst_30 : f32 to vector<8x32xf32>
    %60 = arith.select %57, %58, %59 : vector<8x32xi1>, vector<8x32xf32>
    %61 = math.absf %55 : vector<8x32xf32>
    %cst_31 = arith.constant 0.327591091 : f32
    %62 = vector.broadcast %cst_31 : f32 to vector<8x32xf32>
    %63 = arith.mulf %62, %61 : vector<8x32xf32>
    %cst_32 = arith.constant 1.000000e+00 : f32
    %64 = vector.broadcast %cst_32 : f32 to vector<8x32xf32>
    %65 = arith.addf %64, %63 : vector<8x32xf32>
    %cst_33 = arith.constant 1.000000e+00 : f32
    %66 = vector.broadcast %cst_33 : f32 to vector<8x32xf32>
    %67 = arith.divf %66, %65 : vector<8x32xf32>
    %cst_34 = arith.constant 1.06140542 : f32
    %68 = vector.broadcast %cst_34 : f32 to vector<8x32xf32>
    %69 = arith.mulf %68, %67 : vector<8x32xf32>
    %cst_35 = arith.constant -1.45315206 : f32
    %70 = vector.broadcast %cst_35 : f32 to vector<8x32xf32>
    %71 = arith.addf %69, %70 : vector<8x32xf32>
    %72 = arith.mulf %71, %67 : vector<8x32xf32>
    %cst_36 = arith.constant 1.42141378 : f32
    %73 = vector.broadcast %cst_36 : f32 to vector<8x32xf32>
    %74 = arith.addf %72, %73 : vector<8x32xf32>
    %75 = arith.mulf %74, %67 : vector<8x32xf32>
    %cst_37 = arith.constant -0.284496725 : f32
    %76 = vector.broadcast %cst_37 : f32 to vector<8x32xf32>
    %77 = arith.addf %75, %76 : vector<8x32xf32>
    %78 = arith.mulf %77, %67 : vector<8x32xf32>
    %cst_38 = arith.constant 0.254829586 : f32
    %79 = vector.broadcast %cst_38 : f32 to vector<8x32xf32>
    %80 = arith.addf %78, %79 : vector<8x32xf32>
    %81 = arith.mulf %80, %67 : vector<8x32xf32>
    %cst_39 = arith.constant 0.000000e+00 : f32
    %82 = vector.broadcast %cst_39 : f32 to vector<8x32xf32>
    %83 = arith.subf %82, %61 : vector<8x32xf32>
    %84 = arith.mulf %83, %61 : vector<8x32xf32>
    %85 = math.exp %84 : vector<8x32xf32>
    %86 = arith.mulf %81, %85 : vector<8x32xf32>
    %cst_40 = arith.constant 1.000000e+00 : f32
    %87 = vector.broadcast %cst_40 : f32 to vector<8x32xf32>
    %88 = arith.subf %87, %86 : vector<8x32xf32>
    %89 = arith.mulf %60, %88 : vector<8x32xf32>
    %cst_41 = arith.constant 1.000000e+00 : f32
    %90 = vector.broadcast %cst_41 : f32 to vector<8x32xf32>
    %91 = arith.addf %90, %89 : vector<8x32xf32>
    %92 = arith.mulf %53, %91 : vector<8x32xf32>
    %c0_42 = arith.constant 0 : index
    %c0_43 = arith.constant 0 : index
    %93 = vector.load %arg6[%c0_42, %c0_43] : memref<8x32xf32, #tpu.memory_space<vmem>>, vector<8x32xf32>
    tpu.vector_store %arg6[%c0_42, %c0_43], %92 {strides = array<i32>} : memref<8x32xf32, #tpu.memory_space<vmem>>, vector<8x32xf32>,
    return
  }
  func.func @transform_0(%arg0: i32) -> (i32, i32) {
    %c0_i32 = arith.constant 0 : i32
    %c0_i32_0 = arith.constant 0 : i32
    %c0_i32_1 = arith.constant 0 : i32
    return %c0_i32, %c0_i32_0 : i32, i32
  }
  func.func @transform_1(%arg0: i32) -> (i32, i32) {
    %c0_i32 = arith.constant 0 : i32
    %c0_i32_0 = arith.constant 0 : i32
    %c0_i32_1 = arith.constant 0 : i32
    return %c0_i32, %c0_i32_0 : i32, i32
  }
  func.func @transform_2(%arg0: i32) -> (i32, i32) {
    %c0_i32 = arith.constant 0 : i32
    %c0_i32_0 = arith.constant 0 : i32
    %c0_i32_1 = arith.constant 0 : i32
    return %c0_i32, %c0_i32_0 : i32, i32
  }
  func.func @transform_3(%arg0: i32) -> (i32, i32) {
    %c0_i32 = arith.constant 0 : i32
    %c0_i32_0 = arith.constant 0 : i32
    %c0_i32_1 = arith.constant 0 : i32
    return %c0_i32, %c0_i32_0 : i32, i32
  }
  func.func @transform_4(%arg0: i32) -> (i32, i32) {
    %c0_i32 = arith.constant 0 : i32
    %c0_i32_0 = arith.constant 0 : i32
    %c0_i32_1 = arith.constant 0 : i32
    return %c0_i32, %c0_i32_0 : i32, i32
  }
  func.func @transform_5(%arg0: i32) -> (i32, i32) {
    %c0_i32 = arith.constant 0 : i32
    %c0_i32_0 = arith.constant 0 : i32
    %c0_i32_1 = arith.constant 0 : i32
    return %c0_i32, %c0_i32_0 : i32, i32
  }
}

</mosaic_0001>

<bundles_post_ra>
// kernel: tpu_custom_call.1
= control target key start
LH: loop header
LB: loop body
LE: loop exit
PB: predicated region body
PF: predicated region fallthrough
CT: control target
= control target key end

     0   :  { %10 = vsyncpa [#allocation3], 0  ;;  %s562_s0 = inlined_call_operand.hbm [shape: f32[8,17], index: 0, kind: input, shape index: {}]   ;;  %s563_s1 = inlined_call_operand.hbm [shape: f32[17,32], index: 1, kind: input, shape index: {}]   ;;  %s564_s2 = inlined_call_operand.vmem [shape: f32[1,32], index: 2, kind: input, shape index: {}]   ;;  %s565_s3 = inlined_call_operand.hbm [shape: f32[32,32], index: 3, kind: input, shape index: {}]   ;;  %s566_s4 = inlined_call_operand.vmem [shape: f32[1,32], index: 4, kind: input, shape index: {}]   ;;  %s567_s5 = inlined_call_operand.hbm [shape: f32[8,32], index: 5, kind: output, shape index: {}]  }
   0x1   :  { %11 = vsyncpa [#allocation6], 0 }
   0x2   :  { %12 = vsyncpa [#allocation4], 0  ;;  %s460_s18 = smov [#allocation5]   ;;  %s366_s22 = scalar_lea.hbm %s563_s1, 384 }
   0x3   :  { %s28_s19 = sshll.u32 %s460_s18, 4  ;;  %p367_p0 = scmp.ne.s32.totalorder %s563_s1, %s366_s22  ;;  %s29_s19 = int_to_ptr.vmem [resolvable:$true] %s28_s19 }
   0x4   :  { %p370_p1 = scmp.lt.u32.totalorder %s366_s22, %s563_s1 }
   0x6   :  { %p372_p2 = pnand %p370_p1, %p367_p0 }
   0x8   :  { %375 = shalt.err (!%p372_p2)
}
   0x9   :  { %s376_s27 = scalar_lea.vmem %s29_s19, 384  ;;  %p381_p4 = scmp.lt.s32.totalorder %s29_s19, %s29_s19 }
   0xa   :  { %p377_p3 = scmp.ne.s32.totalorder %s29_s19, %s376_s27  ;;  %p382_p5 = scmp.lt.s32.totalorder %s376_s27, %s376_s27 }
   0xc   :  { %p383_p6 = por %p382_p5, %p381_p4 }
   0xe   :  { %p384_p7 = pnand %p383_p6, %p377_p3 }
  0x10   :  { %387 = shalt.err (!%p384_p7)
}
  0x11   :  { %s461_s28 = smov 128   ;;  %s462_s29 = smov 8  }
  0x12   :  { %34 = dma.hbm_to_vmem [thread:$0]  %s563_s1, 384, %s29_s19, [#allocation6], %s461_s28, %s461_s28, %s462_s29  }
  0x13   :  { %s463_s7 = smov [#allocation2]   ;;  %s464_s9 = smov [#allocation7]  }
  0x14   :  { %s19_s8 = sshll.u32 %s463_s7, 4  ;;  %s42_s10 = sshll.u32 %s464_s9, 4  ;;  %s20_s8 = int_to_ptr.vmem [resolvable:$true] %s19_s8  ;;  %s43_s10 = int_to_ptr.vmem [resolvable:$true] %s42_s10 }
  0x15   :  { %s388_s13 = scalar_lea.hbm %s562_s0, 128 }
  0x16   :  { %p389_p8 = scmp.ne.s32.totalorder %s562_s0, %s388_s13  ;;  %p392_p9 = scmp.lt.u32.totalorder %s388_s13, %s562_s0 }
  0x18   :  { %p394_p10 = pnand %p392_p9, %p389_p8 }
  0x1a   :  { %397 = shalt.err (!%p394_p10)
}
  0x1b   :  { %s398_s1 = scalar_lea.vmem %s20_s8, 128  ;;  %p403_p12 = scmp.lt.s32.totalorder %s20_s8, %s20_s8 }
  0x1c   :  { %p399_p11 = scmp.ne.s32.totalorder %s20_s8, %s398_s1  ;;  %p404_p13 = scmp.lt.s32.totalorder %s398_s1, %s398_s1 }
  0x1e   :  { %p405_p0 = por %p404_p13, %p403_p12 }
  0x20   :  { %p406_p1 = pnand %p405_p0, %p399_p11 }
  0x22   :  { %409 = shalt.err (!%p406_p1)
}
  0x23   :  { %22 = dma.hbm_to_vmem [thread:$0]  %s562_s0, 128, %s20_s8, [#allocation3]  }
  0x24   :  { %s410_s22 = scalar_lea.hbm %s565_s3, 512 }
  0x25   :  { %p411_p2 = scmp.ne.s32.totalorder %s565_s3, %s410_s22  ;;  %p414_p3 = scmp.lt.u32.totalorder %s410_s22, %s565_s3 }
  0x27   :  { %p416_p4 = pnand %p414_p3, %p411_p2 }
  0x29   :  { %419 = shalt.err (!%p416_p4)
}
  0x2a   :  { %s420_s27 = scalar_lea.vmem %s43_s10, 512  ;;  %p425_p6 = scmp.lt.s32.totalorder %s43_s10, %s43_s10 }
  0x2b   :  { %p421_p5 = scmp.ne.s32.totalorder %s43_s10, %s420_s27  ;;  %p426_p7 = scmp.lt.s32.totalorder %s420_s27, %s420_s27 }
  0x2d   :  { %p427_p8 = por %p426_p7, %p425_p6 }
  0x2f   :  { %p428_p9 = pnand %p427_p8, %p421_p5 }
  0x31   :  { %431 = shalt.err (!%p428_p9)
}
  0x32   :  { %48 = dma.hbm_to_vmem [thread:$0]  %s565_s3, 512, %s43_s10, [#allocation6], %s461_s28, %s461_s28, %s462_s29  }
  0x33   :  { %454 = dma.done.wait [#allocation3], 128  }
  0x34   :  { %455 = vsyncadd [#allocation3], 4294967168 }
  0x35   :  { %456 = dma.done.wait [#allocation6], 896  }
  0x36   :  { %457 = vsyncadd [#allocation6], 4294966400  ;;  %v465_v0 = vmov 0.0|0.0   ;;  %vm466_vm0 = vmmov 0   ;;  %v467_v1 = vmov 0.0   ;;  %v61_v2 = vld [vmem:[#allocation5] sm:$0xff] }
  0x37   :  { %339 = vmatprep.subr.bf16.mxu0 %v465_v0  ;;  %325 = vmatprep.mubr.msk.f32.mxu0 %vm466_vm0, %v467_v1  ;;  %v62_v3 = vld [vmem:[#allocation5 + $0x8] sm:$0xff]  ;;  %v63_v5 = vld [vmem:[#allocation5 + $0x10] sm:$0x1]  ;;  %vm75_vm1 = vcmask 1040384   ;;  %v60_v6 = vld [vmem:[#allocation2] sm:$0xff]  ;;  %vm71_vm2 = vcmask 138240  }
  0x38   :  { %342 = vmatprep.subr.bf16.mxu1 %v465_v0  ;;  %336 = vmatprep.mubr.msk.f32.mxu1 %vm466_vm0, %v467_v1  ;;  %v340_v4 = vpack.c.bf16 %v62_v3, %v61_v2  ;;  %v176_v7 = vld [vmem:[#allocation7] sm:$0xff]  ;;  %v177_v8 = vld [vmem:[#allocation7 + $0x8] sm:$0xff]  ;;  %v178_v10 = vld [vmem:[#allocation7 + $0x10] sm:$0xff]  ;;  %v468_v37 = vmov -1.0   ;;  %vm187_vm4 = vcmask 261120  }
  0x39   :  { %v343_v9 = vpack.c.bf16 %v177_v8, %v176_v7  ;;  %v179_v11 = vld [vmem:[#allocation7 + $0x18] sm:$0xff]  ;;  %v305_v13 = vld [vmem:[%s564_s2] ss:$0 sm:$0xff] }
  0x3a   :  { %341 = vmatpush3.bf16.msra.mxu0 %v340_v4  ;;  %v346_v12 = vpack.c.bf16 %v179_v11, %v178_v10  ;;  %v308_v43 = vld [vmem:[%s566_s4] ss:$0 sm:$0xff]  ;;  %s469_s4 = smov [#allocation8]  }
  0x3b   :  { %323 = vmatprep.subr.mxu0 %v467_v1  ;;  %344 = vmatpush3.bf16.msra.mxu1 %v343_v9  ;;  %s295_s6 = sshll.u32 %s469_s4, 4  ;;  %s296_s6 = int_to_ptr.vmem [resolvable:$true] %s295_s6 }
  0x3c   :  { %345 = vmatprep.subr.bf16.mxu1 %v465_v0  ;;  %s432_s7 = scalar_lea.vmem %s296_s6, 128  ;;  %p437_p11 = scmp.lt.s32.totalorder %s296_s6, %s296_s6 }
  0x3d   :  { %p433_p10 = scmp.ne.s32.totalorder %s296_s6, %s432_s7  ;;  %p438_p12 = scmp.lt.s32.totalorder %s432_s7, %s432_s7 }
  0x3e   :  { %324 = vmatpush3.msk.msra.mxu0 %vm75_vm1, %v63_v5 }
  0x3f   :  { %326 = vmatmul.mubr.msk.f32.vlgmr.msra.gmra.mrb[0].mxu0 %vm71_vm2, %v60_v6  ;;  %347 = vmatpush3.bf16.msra.mxu1 %v346_v12  ;;  %p439_p13 = por %p438_p12, %p437_p11 }
  0x41   :  { %p440_p0 = pnand %p439_p13, %p433_p10 }
 0x112   :  { %v145_v14 = vpop.f32.mrb[0].mxu0 }
 0x113   :  { %v146_v15 = vadd.f32 %v305_v13, %v145_v14  ;;  %v327_v16 = vpop.f32.mrb[1].mxu0 }
 0x115   :  { %v150_v17 = vmul.f32 0.70710677, %v146_v15  ;;  %v149_v40 = vmul.f32 0.5, %v146_v15 }
 0x117   :  { %v153_v18 = vand.u32 2147483647, %v150_v17  ;;  %vm151_vm3 = vcmp.ge.f32.partialorder %v150_v17, 0.0 }
 0x118   :  { %v152_v38 = vsel %vm151_vm3, 1.0, %v468_v37 }
 0x119   :  { %v154_v19 = vmul.f32 0.3275911, %v153_v18  ;;  %v167_v21 = vsub.f32 0.0, %v153_v18 }
 0x11b   :  { %v155_v20 = vadd.f32 1.0, %v154_v19  ;;  %v168_v23 = vmul.f32 %v167_v21, %v153_v18 }
 0x11d   :  { %358 = vrcp.f32 %v155_v20  ;;  %v169_v26 = vmul.f32 1.442695, %v168_v23 }
 0x11f   :  { %360 = vpow2.f32 %v169_v26 }
 0x127   :  { %v359_v22 = vpop.eup %358 }
 0x128   :  { %v158_v24 = vmul.f32 1.0614054, %v359_v22 }
 0x129   :  { %v361_v34 = vpop.eup %360 }
 0x12a   :  { %v159_v25 = vadd.f32 -1.4531521, %v158_v24 }
 0x12c   :  { %v160_v27 = vmul.f32 %v359_v22, %v159_v25 }
 0x12e   :  { %v161_v28 = vadd.f32 1.4214138, %v160_v27 }
 0x130   :  { %v162_v29 = vmul.f32 %v359_v22, %v161_v28 }
 0x132   :  { %v163_v30 = vadd.f32 -0.28449672, %v162_v29 }
 0x134   :  { %v164_v31 = vmul.f32 %v359_v22, %v163_v30 }
 0x136   :  { %v165_v32 = vadd.f32 0.2548296, %v164_v31 }
 0x138   :  { %v166_v33 = vmul.f32 %v359_v22, %v165_v32 }
 0x13a   :  { %v171_v35 = vmul.f32 %v361_v34, %v166_v33 }
 0x13c   :  { %v172_v36 = vsub.f32 1.0, %v171_v35 }
 0x13e   :  { %v173_v39 = vmul.f32 %v172_v36, %v152_v38 }
 0x140   :  { %v174_v41 = vadd.f32 1.0, %v173_v39 }
 0x142   :  { %v175_v42 = vmul.f32 %v174_v41, %v149_v40 }
 0x144   :  { %337 = vmatmul.mubr.msk.f32.vlgmr.msra.gmra.mrb[0].mxu1 %vm187_vm4, %v175_v42 }
 0x217   :  { %v257_v44 = vpop.f32.mrb[0].mxu1 }
 0x218   :  { %v258_v45 = vadd.f32 %v308_v43, %v257_v44  ;;  %v338_v46 = vpop.f32.mrb[1].mxu1 }
 0x21a   :  { %v262_v47 = vmul.f32 0.70710677, %v258_v45  ;;  %v261_v5 = vmul.f32 0.5, %v258_v45 }
 0x21c   :  { %v265_v48 = vand.u32 2147483647, %v262_v47  ;;  %vm263_vm5 = vcmp.ge.f32.partialorder %v262_v47, 0.0 }
 0x21d   :  { %v264_v3 = vsel %vm263_vm5, 1.0, %v468_v37 }
 0x21e   :  { %v266_v49 = vmul.f32 0.3275911, %v265_v48  ;;  %v279_v51 = vsub.f32 0.0, %v265_v48 }
 0x220   :  { %v267_v50 = vadd.f32 1.0, %v266_v49  ;;  %v280_v53 = vmul.f32 %v279_v51, %v265_v48 }
 0x222   :  { %362 = vrcp.f32 %v267_v50  ;;  %v281_v56 = vmul.f32 1.442695, %v280_v53 }
 0x224   :  { %364 = vpow2.f32 %v281_v56 }
 0x22c   :  { %v363_v52 = vpop.eup %362 }
 0x22d   :  { %v270_v54 = vmul.f32 1.0614054, %v363_v52 }
 0x22e   :  { %v365_v0 = vpop.eup %364 }
 0x22f   :  { %v271_v55 = vadd.f32 -1.4531521, %v270_v54 }
 0x231   :  { %v272_v57 = vmul.f32 %v363_v52, %v271_v55 }
 0x233   :  { %v273_v58 = vadd.f32 1.4214138, %v272_v57 }
 0x235   :  { %v274_v59 = vmul.f32 %v363_v52, %v273_v58 }
 0x237   :  { %v275_v60 = vadd.f32 -0.28449672, %v274_v59 }
 0x239   :  { %v276_v61 = vmul.f32 %v363_v52, %v275_v60 }
 0x23b   :  { %v277_v62 = vadd.f32 0.2548296, %v276_v61 }
 0x23d   :  { %v278_v63 = vmul.f32 %v363_v52, %v277_v62 }
 0x23f   :  { %v283_v1 = vmul.f32 %v365_v0, %v278_v63 }
 0x241   :  { %v284_v2 = vsub.f32 1.0, %v283_v1 }
 0x243   :  { %v285_v4 = vmul.f32 %v284_v2, %v264_v3 }
 0x245   :  { %v286_v6 = vadd.f32 1.0, %v285_v4 }
 0x247   :  { %v287_v7 = vmul.f32 %v286_v6, %v261_v5 }
 0x249   :  { %288 = vst.msk [vmem:[#allocation8] sm:$0xff] %vm187_vm4, %v287_v7 }
 0x24a   :  { %443 = shalt.err (!%p440_p0)
}
 0x24b   :  { %s444_s10 = scalar_lea.hbm %s567_s5, 128 }
 0x24c   :  { %p445_p1 = scmp.ne.s32.totalorder %s567_s5, %s444_s10  ;;  %p448_p2 = scmp.lt.u32.totalorder %s444_s10, %s567_s5 }
 0x24e   :  { %p450_p3 = pnand %p448_p2, %p445_p1 }
 0x250   :  { %453 = shalt.err (!%p450_p3)
}
 0x251   :  { %298 = dma.vmem_to_hbm [thread:$0]  %s296_s6, 128, %s567_s5, [#allocation4]  }
 0x252   :  { %458 = dma.done.wait [#allocation4], 128  }
 0x253   :  { %459 = vsyncadd [#allocation4], 4294967168 }
 0x254   :  { %302 = vsyncpa [#allocation3], 1 }
 0x255   :  { %303 = vsyncpa [#allocation6], 1 }
 0x256   :  { %304 = vsyncpa [#allocation4], 1 }

</bundles_post_ra>
